<compile_context>
chip_gen: v5e
topology: v5e:2x2
jax: 0.10.0
libtpu: 0.0.40
codegen_flags: <defaults>
</compile_context>

<pallas_src>
import math

import jax
import jax.numpy as jnp
from jax import lax
from jax.experimental import pallas as pl
from jax.experimental.pallas import tpu as pltpu


def _round_up(x, m):
    return ((x + m - 1) // m) * m


def _sigmoid_f32(z):
    # tanh form: one EUP transcendental (vs exp + reciprocal), overflow-safe,
    # and exact (no approx reciprocal error compounding across layers).
    return 0.5 * jnp.tanh(0.5 * z) + 0.5


def _mlp_fused_kernel(x_ref, w1_ref, b1_ref, wh_ref, bh_ref, o_ref):
    # x_ref : (S, TN)    f32   -- one column tile (columns = flattened (b, n)
    #                             or a per-batch n_vars tile, depending on path)
    # w1_ref: (D, S)     bf16  -- PyTorch first_linear weight, VMEM-resident
    # b1_ref: (D, 1)     f32
    # wh_ref: (LH, D, D) bf16  -- stacked hidden-layer weights, VMEM-resident
    # bh_ref: (LH, D, 1) f32
    # o_ref : (D, TN)    f32
    x = x_ref[...].astype(jnp.bfloat16)
    acc = jnp.dot(w1_ref[...], x, preferred_element_type=jnp.float32)
    # f32 epilogue (v5e has no bf16 VPU/EUP), then carry the activation in bf16.
    h = _sigmoid_f32(acc + b1_ref[...]).astype(jnp.bfloat16)

    num_hidden = wh_ref.shape[0]

    def body(l, h):
        acc = jnp.dot(wh_ref[l], h, preferred_element_type=jnp.float32)
        return _sigmoid_f32(acc + bh_ref[l]).astype(jnp.bfloat16)

    h = lax.fori_loop(0, num_hidden, body, h,
                      unroll=(True if num_hidden <= 4 else 2))
    o_ref[...] = h.astype(o_ref.dtype)


def _mlp_first_only_kernel(x_ref, w1_ref, b1_ref, o_ref):
    # Variant for layer_num == 1 (no hidden stack).
    x = x_ref[...].astype(jnp.bfloat16)
    acc = jnp.dot(w1_ref[...], x, preferred_element_type=jnp.float32)
    o_ref[...] = _sigmoid_f32(acc + b1_ref[...]).astype(o_ref.dtype)


def _pick_tile_and_vmem(total_cols, S, D, LH, *, max_tile=512,
                        budget_bytes=40 << 20):
    """Largest column tile (multiple of 128, <= max_tile) that divides
    total_cols and keeps the estimated VMEM footprint under budget."""
    # Resident weights/biases; assume the worst case of 2 buffers each.
    wb = 2 * (D * S * 2 + D * 4 + LH * D * D * 2 + LH * D * 4)

    def est(tn):
        # 2x double-buffered x tile + 2x out tile + live f32 acc / bf16 h / bf16 x.
        return wb + tn * (2 * S * 4 + 2 * D * 4 + D * 6 + S * 2)

    tn = 128
    cap = min(max_tile, total_cols)
    for cand in range(cap, 127, -128):
        if total_cols % cand == 0 and est(cand) <= budget_bytes:
            tn = cand
            break
    e = est(tn)
    vmem_limit = int(min(100 << 20, max(32 << 20, int(e * 1.5) + (4 << 20))))
    return tn, vmem_limit
    # TODO(synk): for very large LH*D*D (> ~24 MiB) or very long seq_len,
    # stream wh per layer / tile the S contraction with pltpu.emit_pipeline
    # instead of keeping everything resident (needed for v7x 64 MiB VMEM).


def mlp_layer_forward(x, params, *, max_tile=512, interpret=False):
    """Equivalent of MLP_layer.forward: (B, S, N) -> (B, d_model, N)."""
    B, S, N = x.shape
    w1, b1 = params["w1"], params["b1"]          # (D,S) bf16, (D,1) f32
    wh, bh = params["wh"], params["bh"]          # (LH,D,D) bf16, (LH,D,1) f32
    D = w1.shape[0]
    LH = 0 if wh is None else wh.shape[0]

    per_batch = (N % 128 == 0)                   # lane axis already dense/aligned

    if per_batch:
        cols = N
        x_in = x
    else:
        # Fold the batch into the lane axis: X -> (S, B*N); pad only to 128.
        x_in = jnp.transpose(x, (1, 0, 2)).reshape(S, B * N)
        cols = _round_up(B * N, 128)
        if cols != B * N:
            x_in = jnp.pad(x_in, ((0, 0), (0, cols - B * N)))

    tn, vmem_limit = _pick_tile_and_vmem(cols, S, D, LH, max_tile=max_tile)

    if per_batch:
        grid = (B, cols // tn)
        x_spec = pl.BlockSpec((None, S, tn), lambda b, n: (b, 0, n))
        o_spec = pl.BlockSpec((None, D, tn), lambda b, n: (b, 0, n))
        out_shape = jax.ShapeDtypeStruct((B, D, N), x.dtype)
        dims = ("parallel", "parallel")
    else:
        grid = (cols // tn,)
        x_spec = pl.BlockSpec((S, tn), lambda n: (0, n))
        o_spec = pl.BlockSpec((D, tn), lambda n: (0, n))
        out_shape = jax.ShapeDtypeStruct((D, cols), x.dtype)
        dims = ("parallel",)

    cparams = pltpu.CompilerParams(dimension_semantics=dims,
                                   vmem_limit_bytes=vmem_limit)

    def const_map(rank):
        zeros = (0,) * rank
        if per_batch:
            return lambda b, n: zeros
        return lambda n: zeros

    def launch(single_buffer_weights):
        kw = ({"pipeline_mode": pl.Buffered(1)} if single_buffer_weights else {})
        w1_spec = pl.BlockSpec((D, S), const_map(2), **kw)
        b1_spec = pl.BlockSpec((D, 1), const_map(2), **kw)
        if LH == 0:
            return pl.pallas_call(
                _mlp_first_only_kernel,
                out_shape=out_shape, grid=grid,
                in_specs=[x_spec, w1_spec, b1_spec], out_specs=o_spec,
                compiler_params=cparams, interpret=interpret,
            )(x_in, w1, b1)
        wh_spec = pl.BlockSpec((LH, D, D), const_map(3), **kw)
        bh_spec = pl.BlockSpec((LH, D, 1), const_map(3), **kw)
        return pl.pallas_call(
            _mlp_fused_kernel,
            out_shape=out_shape, grid=grid,
            in_specs=[x_spec, w1_spec, b1_spec, wh_spec, bh_spec],
            out_specs=o_spec,
            compiler_params=cparams, interpret=interpret,
        )(x_in, w1, b1, wh, bh)

    try:
        out = launch(True)       # single-buffer the constant-index weights
    except Exception:            # this jax build rejects pipeline_mode=Buffered(1)
        out = launch(False)      # fall back to default double-buffering

    if per_batch:
        return out
    # (D, cols) -> (B, D, N); slice + reshape + transpose fuse into one copy.
    return jnp.transpose(out[:, :B * N].reshape(D, B, N), (1, 0, 2))


def init_mlp_params(key, seq_len, d_model, layer_num):
    """nn.Linear-style U(-1/sqrt(fan_in), 1/sqrt(fan_in)) init.

    Weights stored in PyTorch (out_features, in_features) layout, cast to bf16
    for the MXU; biases stay f32 as (D, 1) columns.  f32 copies kept for the
    pure-JAX reference.
    """
    def uniform(k, shape, fan_in):
        bound = 1.0 / math.sqrt(fan_in)
        return jax.random.uniform(k, shape, dtype=jnp.float32,
                                  minval=-bound, maxval=bound)

    k = key
    k, kw, kb = jax.random.split(k, 3)
    w1 = uniform(kw, (d_model, seq_len), seq_len)    # (D, S)
    b1 = uniform(kb, (d_model,), seq_len)

    ws, bs = [], []
    for _ in range(layer_num - 1):
        k, kw, kb = jax.random.split(k, 3)
        ws.append(uniform(kw, (d_model, d_model), d_model))
        bs.append(uniform(kb, (d_model,), d_model))

    return {
        "w1": w1.astype(jnp.bfloat16),
        "b1": b1.reshape(d_model, 1),
        "wh": jnp.stack(ws).astype(jnp.bfloat16) if ws else None,
        "bh": (jnp.stack(bs).reshape(len(bs), d_model, 1) if bs else None),
        # f32 copies for the reference check
        "w1_f32": w1, "b1_f32": b1,
        "wh_f32": jnp.stack(ws) if ws else None,
        "bh_f32": jnp.stack(bs) if bs else None,
    }


def mlp_layer_reference(x, params):
    """Pure-JAX f32 reference of the PyTorch module forward."""
    h = jnp.transpose(x, (0, 2, 1))                              # b s n -> b n s
    h = jax.nn.sigmoid(h @ params["w1_f32"].T + params["b1_f32"])
    if params["wh_f32"] is not None:
        for l in range(params["wh_f32"].shape[0]):
            h = jax.nn.sigmoid(h @ params["wh_f32"][l].T + params["bh_f32"][l])
    return jnp.transpose(h, (0, 2, 1))                           # b n p -> b p n


if __name__ == "__main__":
    # Small shapes consistent with the module:
    #   batch=2, seq_len=8, n_vars=16, d_model=32, layer_num=3
    B, S, N = 2, 8, 16
    d_model, layer_num = 32, 3

    key = jax.random.PRNGKey(0)
    kx, kp = jax.random.split(key)
    x = jax.random.normal(kx, (B, S, N), dtype=jnp.float32)
    params = init_mlp_params(kp, S, d_model, layer_num)

    out = jax.block_until_ready(mlp_layer_forward(x, params))
    assert out.shape == (B, d_model, N), out.shape

    ref = mlp_layer_reference(x, params)
    err = float(jnp.max(jnp.abs(out - ref)))
    # bf16 MXU operands / bf16 activation carry vs pure-f32 reference.
    assert err < 2e-2, err

    print("KERNEL_OK")
</pallas_src>

<mosaic_0001>
module attributes {stable_mosaic.version = 11 : i64} {
  func.func @_mlp_fused_kernel(%arg0: i32, %arg1: memref<8x128xf32, #tpu.memory_space<vmem>>, %arg2: memref<32x8xbf16, #tpu.memory_space<vmem>>, %arg3: memref<32x1xf32, #tpu.memory_space<vmem>>, %arg4: memref<2x32x32xbf16, #tpu.memory_space<vmem>>, %arg5: memref<2x32x1xf32, #tpu.memory_space<vmem>>, %arg6: memref<32x128xf32, #tpu.memory_space<vmem>>) attributes {dimension_semantics = [#tpu.dimension_semantics<parallel>], iteration_bounds = array<i64: 1>, scalar_prefetch = 0 : i64, scratch_operands = 0 : i64, tpu.core_type = #tpu.core_type<tc>, window_params = [{transform_indices = @transform_0, window_bounds = array<i64: 8, 128>}, {pipeline_mode = #tpu.pipeline_mode<synchronous>, transform_indices = @transform_1, window_bounds = array<i64: 32, 8>}, {pipeline_mode = #tpu.pipeline_mode<synchronous>, transform_indices = @transform_2, window_bounds = array<i64: 32, 1>}, {pipeline_mode = #tpu.pipeline_mode<synchronous>, transform_indices = @transform_3, window_bounds = array<i64: 2, 32, 32>}, {pipeline_mode = #tpu.pipeline_mode<synchronous>, transform_indices = @transform_4, window_bounds = array<i64: 2, 32, 1>}, {transform_indices = @transform_5, window_bounds = array<i64: 32, 128>}]} {
    %c0 = arith.constant 0 : index
    %c0_0 = arith.constant 0 : index
    %0 = vector.load %arg1[%c0, %c0_0] : memref<8x128xf32, #tpu.memory_space<vmem>>, vector<8x128xf32>
    %1 = arith.truncf %0 : vector<8x128xf32> to vector<8x128xbf16>
    %c0_1 = arith.constant 0 : index
    %c0_2 = arith.constant 0 : index
    %2 = vector.load %arg2[%c0_1, %c0_2] : memref<32x8xbf16, #tpu.memory_space<vmem>>, vector<32x8xbf16>
    %cst = arith.constant dense<0.000000e+00> : vector<32x128xf32>
    %3 = tpu.matmul %2, %1, %cst {dimension_numbers = #tpu.dot_dimension_numbers<[1], [0], [0], [1], [0, 0, 1, 1], [], []>} : vector<32x8xbf16>, vector<8x128xbf16>, vector<32x128xf32> -> vector<32x128xf32>
    %c0_3 = arith.constant 0 : index
    %c0_4 = arith.constant 0 : index
    %4 = vector.load %arg3[%c0_3, %c0_4] : memref<32x1xf32, #tpu.memory_space<vmem>>, vector<32x1xf32>
    %5 = vector.broadcast %4 : vector<32x1xf32> to vector<32x128xf32>
    %6 = arith.addf %3, %5 : vector<32x128xf32>
    %cst_5 = arith.constant 5.000000e-01 : f32
    %7 = vector.broadcast %cst_5 : f32 to vector<32x128xf32>
    %8 = arith.mulf %7, %6 : vector<32x128xf32>
    %9 = math.tanh %8 : vector<32x128xf32>
    %cst_6 = arith.constant 5.000000e-01 : f32
    %10 = vector.broadcast %cst_6 : f32 to vector<32x128xf32>
    %11 = arith.mulf %10, %9 : vector<32x128xf32>
    %cst_7 = arith.constant 5.000000e-01 : f32
    %12 = vector.broadcast %cst_7 : f32 to vector<32x128xf32>
    %13 = arith.addf %11, %12 : vector<32x128xf32>
    %14 = arith.truncf %13 : vector<32x128xf32> to vector<32x128xbf16>
    %c0_i32 = arith.constant 0 : i32
    %15 = arith.index_cast %c0_i32 : i32 to index
    %c0_8 = arith.constant 0 : index
    %c0_9 = arith.constant 0 : index
    %16 = vector.load %arg4[%15, %c0_8, %c0_9] : memref<2x32x32xbf16, #tpu.memory_space<vmem>>, vector<1x32x32xbf16>
    %17 = vector.shape_cast %16 : vector<1x32x32xbf16> to vector<32x32xbf16>
    %cst_10 = arith.constant dense<0.000000e+00> : vector<32x128xf32>
    %18 = tpu.matmul %17, %14, %cst_10 {dimension_numbers = #tpu.dot_dimension_numbers<[1], [0], [0], [1], [0, 0, 1, 1], [], []>} : vector<32x32xbf16>, vector<32x128xbf16>, vector<32x128xf32> -> vector<32x128xf32>
    %19 = arith.index_cast %c0_i32 : i32 to index
    %c0_11 = arith.constant 0 : index
    %c0_12 = arith.constant 0 : index
    %20 = vector.load %arg5[%19, %c0_11, %c0_12] : memref<2x32x1xf32, #tpu.memory_space<vmem>>, vector<1x32x1xf32>
    %21 = vector.shape_cast %20 : vector<1x32x1xf32> to vector<32x1xf32>
    %22 = vector.broadcast %21 : vector<32x1xf32> to vector<32x128xf32>
    %23 = arith.addf %18, %22 : vector<32x128xf32>
    %cst_13 = arith.constant 5.000000e-01 : f32
    %24 = vector.broadcast %cst_13 : f32 to vector<32x128xf32>
    %25 = arith.mulf %24, %23 : vector<32x128xf32>
    %26 = math.tanh %25 : vector<32x128xf32>
    %cst_14 = arith.constant 5.000000e-01 : f32
    %27 = vector.broadcast %cst_14 : f32 to vector<32x128xf32>
    %28 = arith.mulf %27, %26 : vector<32x128xf32>
    %cst_15 = arith.constant 5.000000e-01 : f32
    %29 = vector.broadcast %cst_15 : f32 to vector<32x128xf32>
    %30 = arith.addf %28, %29 : vector<32x128xf32>
    %31 = arith.truncf %30 : vector<32x128xf32> to vector<32x128xbf16>
    %c1_i32 = arith.constant 1 : i32
    %32 = arith.index_cast %c1_i32 : i32 to index
    %c0_16 = arith.constant 0 : index
    %c0_17 = arith.constant 0 : index
    %33 = vector.load %arg4[%32, %c0_16, %c0_17] : memref<2x32x32xbf16, #tpu.memory_space<vmem>>, vector<1x32x32xbf16>
    %34 = vector.shape_cast %33 : vector<1x32x32xbf16> to vector<32x32xbf16>
    %cst_18 = arith.constant dense<0.000000e+00> : vector<32x128xf32>
    %35 = tpu.matmul %34, %31, %cst_18 {dimension_numbers = #tpu.dot_dimension_numbers<[1], [0], [0], [1], [0, 0, 1, 1], [], []>} : vector<32x32xbf16>, vector<32x128xbf16>, vector<32x128xf32> -> vector<32x128xf32>
    %36 = arith.index_cast %c1_i32 : i32 to index
    %c0_19 = arith.constant 0 : index
    %c0_20 = arith.constant 0 : index
    %37 = vector.load %arg5[%36, %c0_19, %c0_20] : memref<2x32x1xf32, #tpu.memory_space<vmem>>, vector<1x32x1xf32>
    %38 = vector.shape_cast %37 : vector<1x32x1xf32> to vector<32x1xf32>
    %39 = vector.broadcast %38 : vector<32x1xf32> to vector<32x128xf32>
    %40 = arith.addf %35, %39 : vector<32x128xf32>
    %cst_21 = arith.constant 5.000000e-01 : f32
    %41 = vector.broadcast %cst_21 : f32 to vector<32x128xf32>
    %42 = arith.mulf %41, %40 : vector<32x128xf32>
    %43 = math.tanh %42 : vector<32x128xf32>
    %cst_22 = arith.constant 5.000000e-01 : f32
    %44 = vector.broadcast %cst_22 : f32 to vector<32x128xf32>
    %45 = arith.mulf %44, %43 : vector<32x128xf32>
    %cst_23 = arith.constant 5.000000e-01 : f32
    %46 = vector.broadcast %cst_23 : f32 to vector<32x128xf32>
    %47 = arith.addf %45, %46 : vector<32x128xf32>
    %48 = arith.truncf %47 : vector<32x128xf32> to vector<32x128xbf16>
    %c2_i32 = arith.constant 2 : i32
    %49 = arith.extf %48 : vector<32x128xbf16> to vector<32x128xf32>
    %c0_24 = arith.constant 0 : index
    %c0_25 = arith.constant 0 : index
    %50 = vector.load %arg6[%c0_24, %c0_25] : memref<32x128xf32, #tpu.memory_space<vmem>>, vector<32x128xf32>
    tpu.vector_store %arg6[%c0_24, %c0_25], %49 {strides = array<i32>} : memref<32x128xf32, #tpu.memory_space<vmem>>, vector<32x128xf32>,
    return
  }
  func.func @transform_0(%arg0: i32) -> (i32, i32) {
    %c0_i32 = arith.constant 0 : i32
    %c0_i32_0 = arith.constant 0 : i32
    return %c0_i32, %arg0 : i32, i32
  }
  func.func @transform_1(%arg0: i32) -> (i32, i32) {
    %c0_i32 = arith.constant 0 : i32
    %c0_i32_0 = arith.constant 0 : i32
    %c0_i32_1 = arith.constant 0 : i32
    return %c0_i32, %c0_i32_0 : i32, i32
  }
  func.func @transform_2(%arg0: i32) -> (i32, i32) {
    %c0_i32 = arith.constant 0 : i32
    %c0_i32_0 = arith.constant 0 : i32
    %c0_i32_1 = arith.constant 0 : i32
    return %c0_i32, %c0_i32_0 : i32, i32
  }
  func.func @transform_3(%arg0: i32) -> (i32, i32, i32) {
    %c0_i32 = arith.constant 0 : i32
    %c0_i32_0 = arith.constant 0 : i32
    %c0_i32_1 = arith.constant 0 : i32
    %c0_i32_2 = arith.constant 0 : i32
    return %c0_i32, %c0_i32_0, %c0_i32_1 : i32, i32, i32
  }
  func.func @transform_4(%arg0: i32) -> (i32, i32, i32) {
    %c0_i32 = arith.constant 0 : i32
    %c0_i32_0 = arith.constant 0 : i32
    %c0_i32_1 = arith.constant 0 : i32
    %c0_i32_2 = arith.constant 0 : i32
    return %c0_i32, %c0_i32_0, %c0_i32_1 : i32, i32, i32
  }
  func.func @transform_5(%arg0: i32) -> (i32, i32) {
    %c0_i32 = arith.constant 0 : i32
    %c0_i32_0 = arith.constant 0 : i32
    return %c0_i32, %arg0 : i32, i32
  }
}

module attributes {stable_mosaic.version = 11 : i64} {
  func.func @_mlp_fused_kernel(%arg0: i32, %arg1: memref<8x128xf32, #tpu.memory_space<vmem>>, %arg2: memref<32x8xbf16, #tpu.memory_space<vmem>>, %arg3: memref<32x1xf32, #tpu.memory_space<vmem>>, %arg4: memref<2x32x32xbf16, #tpu.memory_space<vmem>>, %arg5: memref<2x32x1xf32, #tpu.memory_space<vmem>>, %arg6: memref<32x128xf32, #tpu.memory_space<vmem>>) attributes {dimension_semantics = [#tpu.dimension_semantics<parallel>], iteration_bounds = array<i64: 1>, scalar_prefetch = 0 : i64, scratch_operands = 0 : i64, tpu.core_type = #tpu.core_type<tc>, window_params = [{transform_indices = @transform_0, window_bounds = array<i64: 8, 128>}, {pipeline_mode = #tpu.pipeline_mode<synchronous>, transform_indices = @transform_1, window_bounds = array<i64: 32, 8>}, {pipeline_mode = #tpu.pipeline_mode<synchronous>, transform_indices = @transform_2, window_bounds = array<i64: 32, 1>}, {pipeline_mode = #tpu.pipeline_mode<synchronous>, transform_indices = @transform_3, window_bounds = array<i64: 2, 32, 32>}, {pipeline_mode = #tpu.pipeline_mode<synchronous>, transform_indices = @transform_4, window_bounds = array<i64: 2, 32, 1>}, {transform_indices = @transform_5, window_bounds = array<i64: 32, 128>}]} {
    %c0 = arith.constant 0 : index
    %c0_0 = arith.constant 0 : index
    %0 = vector.load %arg1[%c0, %c0_0] : memref<8x128xf32, #tpu.memory_space<vmem>>, vector<8x128xf32>
    %1 = arith.truncf %0 : vector<8x128xf32> to vector<8x128xbf16>
    %c0_1 = arith.constant 0 : index
    %c0_2 = arith.constant 0 : index
    %2 = vector.load %arg2[%c0_1, %c0_2] : memref<32x8xbf16, #tpu.memory_space<vmem>>, vector<32x8xbf16>
    %cst = arith.constant dense<0.000000e+00> : vector<32x128xf32>
    %3 = tpu.matmul %2, %1, %cst {dimension_numbers = #tpu.dot_dimension_numbers<[1], [0], [0], [1], [0, 0, 1, 1], [], []>} : vector<32x8xbf16>, vector<8x128xbf16>, vector<32x128xf32> -> vector<32x128xf32>
    %c0_3 = arith.constant 0 : index
    %c0_4 = arith.constant 0 : index
    %4 = vector.load %arg3[%c0_3, %c0_4] : memref<32x1xf32, #tpu.memory_space<vmem>>, vector<32x1xf32>
    %5 = vector.broadcast %4 : vector<32x1xf32> to vector<32x128xf32>
    %6 = arith.addf %3, %5 : vector<32x128xf32>
    %cst_5 = arith.constant 5.000000e-01 : f32
    %7 = vector.broadcast %cst_5 : f32 to vector<32x128xf32>
    %8 = arith.mulf %7, %6 : vector<32x128xf32>
    %9 = math.tanh %8 : vector<32x128xf32>
    %cst_6 = arith.constant 5.000000e-01 : f32
    %10 = vector.broadcast %cst_6 : f32 to vector<32x128xf32>
    %11 = arith.mulf %10, %9 : vector<32x128xf32>
    %cst_7 = arith.constant 5.000000e-01 : f32
    %12 = vector.broadcast %cst_7 : f32 to vector<32x128xf32>
    %13 = arith.addf %11, %12 : vector<32x128xf32>
    %14 = arith.truncf %13 : vector<32x128xf32> to vector<32x128xbf16>
    %c0_i32 = arith.constant 0 : i32
    %15 = arith.index_cast %c0_i32 : i32 to index
    %c0_8 = arith.constant 0 : index
    %c0_9 = arith.constant 0 : index
    %16 = vector.load %arg4[%15, %c0_8, %c0_9] : memref<2x32x32xbf16, #tpu.memory_space<vmem>>, vector<1x32x32xbf16>
    %17 = vector.shape_cast %16 : vector<1x32x32xbf16> to vector<32x32xbf16>
    %cst_10 = arith.constant dense<0.000000e+00> : vector<32x128xf32>
    %18 = tpu.matmul %17, %14, %cst_10 {dimension_numbers = #tpu.dot_dimension_numbers<[1], [0], [0], [1], [0, 0, 1, 1], [], []>} : vector<32x32xbf16>, vector<32x128xbf16>, vector<32x128xf32> -> vector<32x128xf32>
    %19 = arith.index_cast %c0_i32 : i32 to index
    %c0_11 = arith.constant 0 : index
    %c0_12 = arith.constant 0 : index
    %20 = vector.load %arg5[%19, %c0_11, %c0_12] : memref<2x32x1xf32, #tpu.memory_space<vmem>>, vector<1x32x1xf32>
    %21 = vector.shape_cast %20 : vector<1x32x1xf32> to vector<32x1xf32>
    %22 = vector.broadcast %21 : vector<32x1xf32> to vector<32x128xf32>
    %23 = arith.addf %18, %22 : vector<32x128xf32>
    %cst_13 = arith.constant 5.000000e-01 : f32
    %24 = vector.broadcast %cst_13 : f32 to vector<32x128xf32>
    %25 = arith.mulf %24, %23 : vector<32x128xf32>
    %26 = math.tanh %25 : vector<32x128xf32>
    %cst_14 = arith.constant 5.000000e-01 : f32
    %27 = vector.broadcast %cst_14 : f32 to vector<32x128xf32>
    %28 = arith.mulf %27, %26 : vector<32x128xf32>
    %cst_15 = arith.constant 5.000000e-01 : f32
    %29 = vector.broadcast %cst_15 : f32 to vector<32x128xf32>
    %30 = arith.addf %28, %29 : vector<32x128xf32>
    %31 = arith.truncf %30 : vector<32x128xf32> to vector<32x128xbf16>
    %c1_i32 = arith.constant 1 : i32
    %32 = arith.index_cast %c1_i32 : i32 to index
    %c0_16 = arith.constant 0 : index
    %c0_17 = arith.constant 0 : index
    %33 = vector.load %arg4[%32, %c0_16, %c0_17] : memref<2x32x32xbf16, #tpu.memory_space<vmem>>, vector<1x32x32xbf16>
    %34 = vector.shape_cast %33 : vector<1x32x32xbf16> to vector<32x32xbf16>
    %cst_18 = arith.constant dense<0.000000e+00> : vector<32x128xf32>
    %35 = tpu.matmul %34, %31, %cst_18 {dimension_numbers = #tpu.dot_dimension_numbers<[1], [0], [0], [1], [0, 0, 1, 1], [], []>} : vector<32x32xbf16>, vector<32x128xbf16>, vector<32x128xf32> -> vector<32x128xf32>
    %36 = arith.index_cast %c1_i32 : i32 to index
    %c0_19 = arith.constant 0 : index
    %c0_20 = arith.constant 0 : index
    %37 = vector.load %arg5[%36, %c0_19, %c0_20] : memref<2x32x1xf32, #tpu.memory_space<vmem>>, vector<1x32x1xf32>
    %38 = vector.shape_cast %37 : vector<1x32x1xf32> to vector<32x1xf32>
    %39 = vector.broadcast %38 : vector<32x1xf32> to vector<32x128xf32>
    %40 = arith.addf %35, %39 : vector<32x128xf32>
    %cst_21 = arith.constant 5.000000e-01 : f32
    %41 = vector.broadcast %cst_21 : f32 to vector<32x128xf32>
    %42 = arith.mulf %41, %40 : vector<32x128xf32>
    %43 = math.tanh %42 : vector<32x128xf32>
    %cst_22 = arith.constant 5.000000e-01 : f32
    %44 = vector.broadcast %cst_22 : f32 to vector<32x128xf32>
    %45 = arith.mulf %44, %43 : vector<32x128xf32>
    %cst_23 = arith.constant 5.000000e-01 : f32
    %46 = vector.broadcast %cst_23 : f32 to vector<32x128xf32>
    %47 = arith.addf %45, %46 : vector<32x128xf32>
    %48 = arith.truncf %47 : vector<32x128xf32> to vector<32x128xbf16>
    %c2_i32 = arith.constant 2 : i32
    %49 = arith.extf %48 : vector<32x128xbf16> to vector<32x128xf32>
    %c0_24 = arith.constant 0 : index
    %c0_25 = arith.constant 0 : index
    %50 = vector.load %arg6[%c0_24, %c0_25] : memref<32x128xf32, #tpu.memory_space<vmem>>, vector<32x128xf32>
    tpu.vector_store %arg6[%c0_24, %c0_25], %49 {strides = array<i32>} : memref<32x128xf32, #tpu.memory_space<vmem>>, vector<32x128xf32>,
    return
  }
  func.func @transform_0(%arg0: i32) -> (i32, i32) {
    %c0_i32 = arith.constant 0 : i32
    %c0_i32_0 = arith.constant 0 : i32
    return %c0_i32, %arg0 : i32, i32
  }
  func.func @transform_1(%arg0: i32) -> (i32, i32) {
    %c0_i32 = arith.constant 0 : i32
    %c0_i32_0 = arith.constant 0 : i32
    %c0_i32_1 = arith.constant 0 : i32
    return %c0_i32, %c0_i32_0 : i32, i32
  }
  func.func @transform_2(%arg0: i32) -> (i32, i32) {
    %c0_i32 = arith.constant 0 : i32
    %c0_i32_0 = arith.constant 0 : i32
    %c0_i32_1 = arith.constant 0 : i32
    return %c0_i32, %c0_i32_0 : i32, i32
  }
  func.func @transform_3(%arg0: i32) -> (i32, i32, i32) {
    %c0_i32 = arith.constant 0 : i32
    %c0_i32_0 = arith.constant 0 : i32
    %c0_i32_1 = arith.constant 0 : i32
    %c0_i32_2 = arith.constant 0 : i32
    return %c0_i32, %c0_i32_0, %c0_i32_1 : i32, i32, i32
  }
  func.func @transform_4(%arg0: i32) -> (i32, i32, i32) {
    %c0_i32 = arith.constant 0 : i32
    %c0_i32_0 = arith.constant 0 : i32
    %c0_i32_1 = arith.constant 0 : i32
    %c0_i32_2 = arith.constant 0 : i32
    return %c0_i32, %c0_i32_0, %c0_i32_1 : i32, i32, i32
  }
  func.func @transform_5(%arg0: i32) -> (i32, i32) {
    %c0_i32 = arith.constant 0 : i32
    %c0_i32_0 = arith.constant 0 : i32
    return %c0_i32, %arg0 : i32, i32
  }
}

</mosaic_0001>

<bundles_post_ra>
// kernel: tpu_custom_call.1
= control target key start
LH: loop header
LB: loop body
LE: loop exit
PB: predicated region body
PF: predicated region fallthrough
CT: control target
= control target key end

     0   :  { %vm69_vm0 = vcmask 1043456   ;;  %v406_v3 = vmov 0   ;;  %s504_s0 = inlined_call_operand.vmem [shape: f32[8,128], index: 0, kind: input, shape index: {}]   ;;  %s505_s1 = inlined_call_operand.vmem [shape: bf16[32,8], index: 1, kind: input, shape index: {}]   ;;  %s506_s2 = inlined_call_operand.vmem [shape: f32[32,1], index: 2, kind: input, shape index: {}]   ;;  %s507_s3 = inlined_call_operand.vmem [shape: bf16[2,32,32], index: 3, kind: input, shape index: {}]   ;;  %s508_s4 = inlined_call_operand.vmem [shape: f32[2,32,1], index: 4, kind: input, shape index: {}]   ;;  %s509_s5 = inlined_call_operand.hbm [shape: f32[32,128], index: 5, kind: output, shape index: {}]  }
   0x1   :  { %v22_v0 = vld [vmem:[%s504_s0] sm:$0xff]  ;;  %v30_v1 = vld [vmem:[%s506_s2 + $0x10] sm:$0xff]  ;;  %353 = vset.pattern.permute.xlu0 %v406_v3  ;;  %354 = vset.pattern.permute.xlu1 %v406_v3 }
   0x2   :  { %v23_v2 = vpack.c.bf16 %v22_v0, %v22_v0  ;;  %v28_v4 = vld [vmem:[%s506_s2] sm:$0xff]  ;;  %44 = vperm.xlu0 %353, %v30_v1   ;;  %355 = vset.pattern.permute.xlu2 %v406_v3 }
   0x3   :  { %34 = vperm.xlu1 %354, %v28_v4   ;;  %v341_v6 = vld [vmem:[%s505_s1] sm:$0xff] }
   0x4   :  { %v71_v5 = vsel %vm69_vm0, %v23_v2, 0 }
   0x5   :  { %10 = vsyncpa [#allocation3], 0  ;;  %80 = vmatpush.bf16.msra.mxu0 %v71_v5  ;;  %vm62_vm1 = vcmask 64512   ;;  %v31_v7 = vld [vmem:[%s506_s2 + $0x18] sm:$0xff]  ;;  %v29_v8 = vld [vmem:[%s506_s2 + $0x8] sm:$0xff]  ;;  %vm148_vm2 = vcmask 261120  }
   0x6   :  { %v114_v9 = vld [vmem:[%s508_s4] sm:$0xff]  ;;  %v115_v10 = vld [vmem:[%s508_s4 + $0x8] sm:$0xff]  ;;  %v329_v13 = vld [vmem:[%s508_s4 + $0x30] sm:$0xff]  ;;  %s291_s29 = sshll.u32 %s509_s5, 4  ;;  %s408_s30 = smov 128   ;;  %s292_s29 = int_to_ptr.hbm [resolvable:$true] %s291_s29 }
   0x7   :  { %v342_v11 = vld [vmem:[%s505_s1 + $0x8] sm:$0xff]  ;;  %v116_v20 = vld [vmem:[%s508_s4 + $0x10] sm:$0xff]  ;;  %v117_v26 = vld [vmem:[%s508_s4 + $0x18] sm:$0xff]  ;;  %s409_s6 = smov 8  }
   0x8   :  { %311 = vmatmul.msk.bf16.vlgmr.msra.gmra.mxu0 %vm62_vm1, %v341_v6  ;;  %v328_v12 = vld [vmem:[%s508_s4 + $0x28] sm:$0xff]  ;;  %130 = vperm.xlu2 %355, %v116_v20   ;;  %v327_v33 = vld [vmem:[%s508_s4 + $0x20] sm:$0xff]  ;;  %v330_v45 = vld [vmem:[%s508_s4 + $0x38] sm:$0xff] }
   0x9   :  { %v343_v48 = vld [vmem:[%s507_s3] sm:$0xff]  ;;  %v344_v49 = vld [vmem:[%s507_s3 + $0x8] sm:$0xff] }
   0xa   :  { %49 = vperm.xlu0 %353, %v31_v7  }
   0xb   :  { %39 = vperm.xlu1 %354, %v29_v8  }
  0x10   :  { %135 = vperm.xlu2 %355, %v117_v26  }
  0x12   :  { %120 = vperm.xlu0 %353, %v114_v9  }
  0x13   :  { %125 = vperm.xlu1 %354, %v115_v10  }
  0x18   :  { %312 = vmatmul.msk.bf16.gmra.mxu0 %vm62_vm1, %v342_v11  ;;  %204 = vperm.xlu2 %355, %v327_v33  }
  0x1a   :  { %209 = vperm.xlu0 %353, %v328_v12  }
  0x1b   :  { %214 = vperm.xlu1 %354, %v329_v13  }
  0x20   :  { %219 = vperm.xlu2 %355, %v330_v45  }
  0x62   :  { %v131_v51 = vpop.permute.xlu2 %130 }
  0x6a   :  { %v136_v61 = vpop.permute.xlu2 %135 }
  0x74   :  { %v45_v17 = vpop.permute.xlu0 %44 }
  0x75   :  { %v35_v15 = vpop.permute.xlu1 %34 }
  0x7c   :  { %v50_v27 = vpop.permute.xlu0 %49 }
  0x7d   :  { %v40_v21 = vpop.permute.xlu1 %39 }
  0x84   :  { %v121_v56 = vpop.permute.xlu0 %120 }
  0x85   :  { %v82_v14 = vpop.f32.mrf.mxu0  ;;  %v126_v54 = vpop.permute.xlu1 %125 }
  0x86   :  { %v83_v23 = vadd.f32 %v82_v14, %v35_v15 }
  0x88   :  { %v92_v28 = vmul.f32 0.5, %v83_v23 }
  0x8d   :  { %v84_v16 = vpop.f32.mrf.mxu0 }
  0x8e   :  { %v85_v22 = vadd.f32 %v84_v16, %v40_v21  ;;  %v345_v16 = vld [vmem:[%s507_s3 + $0x10] sm:$0xff] }
  0x90   :  { %v93_v25 = vmul.f32 0.5, %v85_v22  ;;  %v210_v22 = vpop.permute.xlu0 %209 }
  0x95   :  { %v87_v18 = vpop.f32.mrf.mxu0 }
  0x96   :  { %v88_v19 = vadd.f32 %v87_v18, %v45_v17  ;;  %v346_v17 = vld [vmem:[%s507_s3 + $0x18] sm:$0xff]  ;;  %v205_v18 = vpop.permute.xlu2 %204  ;;  %s407_s3 = smov [#allocation2]  }
  0x97   :  { %s289_s26 = sshll.u32 %s407_s3, 4  ;;  %s290_s26 = int_to_ptr.vmem [resolvable:$true] %s289_s26 }
  0x98   :  { %v94_v24 = vmul.f32 0.5, %v88_v19 }
  0x9a   :  { %356 = vtanh.f32 %v94_v24 }
  0x9b   :  { %358 = vtanh.f32 %v93_v25 }
  0x9c   :  { %360 = vtanh.f32 %v92_v28 }
  0x9d   :  { %v89_v29 = vpop.f32.mrf.mxu0 }
  0x9e   :  { %v90_v30 = vadd.f32 %v89_v29, %v50_v27  ;;  %v215_v29 = vpop.permute.xlu1 %214 }
  0xa0   :  { %v95_v31 = vmul.f32 0.5, %v90_v30  ;;  %v357_v32 = vpop.eup %356 }
  0xa1   :  { %v359_v34 = vpop.eup %358  ;;  %v102_v36 = vmul.f32 0.5, %v357_v32 }
  0xa2   :  { %362 = vtanh.f32 %v95_v31  ;;  %v361_v35 = vpop.eup %360  ;;  %v101_v38 = vmul.f32 0.5, %v359_v34 }
  0xa3   :  { %v100_v40 = vmul.f32 0.5, %v361_v35  ;;  %v106_v41 = vadd.f32 0.5, %v102_v36 }
  0xa4   :  { %v105_v44 = vadd.f32 0.5, %v101_v38  ;;  %v220_v38 = vpop.permute.xlu2 %219 }
  0xa5   :  { %v104_v46 = vadd.f32 0.5, %v100_v40 }
  0xa7   :  { %v108_v47 = vpack.c.bf16 %v105_v44, %v104_v46 }
  0xa8   :  { %v363_v37 = vpop.eup %362 }
  0xa9   :  { %v103_v39 = vmul.f32 0.5, %v363_v37 }
  0xab   :  { %v107_v42 = vadd.f32 0.5, %v103_v39 }
  0xad   :  { %v109_v43 = vpack.c.bf16 %v107_v42, %v106_v41 }
  0xaf   :  { %161 = vmatpush.bf16.msra.mxu1 %v109_v43  ;;  %347 = vmatpush.bf16.msra.mxu3 %v109_v43 }
  0xb3   :  { %162 = vmatpush.bf16.msra.mxu1 %v108_v47  ;;  %348 = vmatpush.bf16.msra.mxu3 %v108_v47 }
  0xb6   :  { %321 = vmatmul.msk.bf16.vlgmr.msra.gmra.mxu1 %vm148_vm2, %v343_v48  ;;  %322 = vmatmul.msk.bf16.vlgmr.msra.gmra.mxu3 %vm148_vm2, %v344_v49 }
 0x133   :  { %v164_v50 = vpop.f32.mrf.mxu1 }
 0x134   :  { %v165_v58 = vadd.f32 %v164_v50, %v121_v56 }
 0x136   :  { %v174_v62 = vmul.f32 0.5, %v165_v58 }
 0x139   :  { %v169_v52 = vpop.f32.mrf.mxu3 }
 0x13a   :  { %v170_v53 = vadd.f32 %v169_v52, %v131_v51 }
 0x13b   :  { %v166_v55 = vpop.f32.mrf.mxu1 }
 0x13c   :  { %v167_v57 = vadd.f32 %v166_v55, %v126_v54  ;;  %v176_v59 = vmul.f32 0.5, %v170_v53 }
 0x13e   :  { %v175_v60 = vmul.f32 0.5, %v167_v57  ;;  %364 = vtanh.f32 %v176_v59 }
 0x140   :  { %366 = vtanh.f32 %v175_v60 }
 0x141   :  { %v171_v63 = vpop.f32.mrf.mxu3  ;;  %368 = vtanh.f32 %v174_v62 }
 0x142   :  { %v172_v0 = vadd.f32 %v171_v63, %v136_v61 }
 0x144   :  { %v177_v1 = vmul.f32 0.5, %v172_v0  ;;  %v365_v2 = vpop.eup %364 }
 0x145   :  { %v184_v5 = vmul.f32 0.5, %v365_v2 }
 0x146   :  { %370 = vtanh.f32 %v177_v1  ;;  %v367_v3 = vpop.eup %366 }
 0x147   :  { %v369_v4 = vpop.eup %368  ;;  %v183_v7 = vmul.f32 0.5, %v367_v3  ;;  %v188_v10 = vadd.f32 0.5, %v184_v5 }
 0x148   :  { %v182_v9 = vmul.f32 0.5, %v369_v4 }
 0x149   :  { %v187_v13 = vadd.f32 0.5, %v183_v7 }
 0x14a   :  { %v186_v14 = vadd.f32 0.5, %v182_v9 }
 0x14c   :  { %v371_v6 = vpop.eup %370  ;;  %v190_v15 = vpack.c.bf16 %v187_v13, %v186_v14 }
 0x14d   :  { %v185_v8 = vmul.f32 0.5, %v371_v6 }
 0x14f   :  { %v189_v11 = vadd.f32 0.5, %v185_v8 }
 0x151   :  { %v191_v12 = vpack.c.bf16 %v189_v11, %v188_v10 }
 0x153   :  { %244 = vmatpush.bf16.msra.mxu2 %v191_v12 }
 0x157   :  { %245 = vmatpush.bf16.msra.mxu2 %v190_v15 }
 0x15a   :  { %339 = vmatmul.msk.bf16.vlgmr.msra.gmra.mxu2 %vm148_vm2, %v345_v16 }
 0x16a   :  { %340 = vmatmul.msk.bf16.gmra.mxu2 %vm148_vm2, %v346_v17 }
 0x1dd   :  { %v247_v19 = vpop.f32.mrf.mxu2 }
 0x1de   :  { %v248_v20 = vadd.f32 %v247_v19, %v205_v18 }
 0x1e0   :  { %v257_v21 = vmul.f32 0.5, %v248_v20 }
 0x1e2   :  { %372 = vtanh.f32 %v257_v21 }
 0x1e5   :  { %v249_v23 = vpop.f32.mrf.mxu2 }
 0x1e6   :  { %v250_v24 = vadd.f32 %v249_v23, %v210_v22 }
 0x1e8   :  { %v373_v25 = vpop.eup %372  ;;  %v258_v26 = vmul.f32 0.5, %v250_v24 }
 0x1e9   :  { %v265_v27 = vmul.f32 0.5, %v373_v25 }
 0x1ea   :  { %374 = vtanh.f32 %v258_v26 }
 0x1eb   :  { %v269_v28 = vadd.f32 0.5, %v265_v27 }
 0x1ed   :  { %v273_v30 = vpack.c.bf16 %v269_v28, %v269_v28  ;;  %v252_v31 = vpop.f32.mrf.mxu2 }
 0x1ee   :  { %v253_v32 = vadd.f32 %v252_v31, %v215_v29 }
 0x1ef   :  { %v277_v33 = vunpack.c.l.bf16 %v273_v30 }
 0x1f0   :  { %v375_v34 = vpop.eup %374  ;;  %v259_v35 = vmul.f32 0.5, %v253_v32 }
 0x1f1   :  { %281 = vst [vmem:[#allocation2] sm:$0xff] %v277_v33  ;;  %v266_v36 = vmul.f32 0.5, %v375_v34 }
 0x1f2   :  { %376 = vtanh.f32 %v259_v35 }
 0x1f3   :  { %v270_v37 = vadd.f32 0.5, %v266_v36 }
 0x1f5   :  { %v274_v39 = vpack.c.bf16 %v270_v37, %v270_v37  ;;  %v254_v40 = vpop.f32.mrf.mxu2 }
 0x1f6   :  { %v255_v41 = vadd.f32 %v254_v40, %v220_v38 }
 0x1f7   :  { %v278_v42 = vunpack.c.l.bf16 %v274_v39 }
 0x1f8   :  { %v377_v43 = vpop.eup %376  ;;  %v260_v44 = vmul.f32 0.5, %v255_v41 }
 0x1f9   :  { %282 = vst [vmem:[#allocation2 + $0x8] sm:$0xff] %v278_v42  ;;  %v267_v45 = vmul.f32 0.5, %v377_v43 }
 0x1fa   :  { %378 = vtanh.f32 %v260_v44 }
 0x1fb   :  { %v271_v46 = vadd.f32 0.5, %v267_v45 }
 0x1fd   :  { %v275_v47 = vpack.c.bf16 %v271_v46, %v271_v46 }
 0x1ff   :  { %v279_v48 = vunpack.c.l.bf16 %v275_v47 }
 0x200   :  { %v379_v49 = vpop.eup %378 }
 0x201   :  { %283 = vst [vmem:[#allocation2 + $0x10] sm:$0xff] %v279_v48  ;;  %v268_v50 = vmul.f32 0.5, %v379_v49 }
 0x203   :  { %v272_v51 = vadd.f32 0.5, %v268_v50 }
 0x205   :  { %v276_v52 = vpack.c.bf16 %v272_v51, %v272_v51 }
 0x207   :  { %v280_v53 = vunpack.c.l.bf16 %v276_v52 }
 0x209   :  { %284 = vst [vmem:[#allocation2 + $0x18] sm:$0xff] %v280_v53 }
 0x20a   :  { %297 = dma.vmem_to_hbm [thread:$0]  %s290_s26, 512, %s292_s29, [#allocation3], %s408_s30, %s408_s30, %s409_s6  }
 0x20b   :  { %404 = dma.done.wait [#allocation3], 512  }
 0x20c   :  { %405 = vsyncadd [#allocation3], 4294966784 }
 0x20d   :  { %302 = vsyncpa [#allocation3], 1 }

// kernel: tpu_custom_call.1
= control target key start
LH: loop header
LB: loop body
LE: loop exit
PB: predicated region body
PF: predicated region fallthrough
CT: control target
= control target key end

     0   :  { %vm69_vm0 = vcmask 1043456   ;;  %v406_v3 = vmov 0   ;;  %s504_s0 = inlined_call_operand.vmem [shape: f32[8,128], index: 0, kind: input, shape index: {}]   ;;  %s505_s1 = inlined_call_operand.vmem [shape: bf16[32,8], index: 1, kind: input, shape index: {}]   ;;  %s506_s2 = inlined_call_operand.vmem [shape: f32[32,1], index: 2, kind: input, shape index: {}]   ;;  %s507_s3 = inlined_call_operand.vmem [shape: bf16[2,32,32], index: 3, kind: input, shape index: {}]   ;;  %s508_s4 = inlined_call_operand.vmem [shape: f32[2,32,1], index: 4, kind: input, shape index: {}]   ;;  %s509_s5 = inlined_call_operand.hbm [shape: f32[32,128], index: 5, kind: output, shape index: {}]  }
   0x1   :  { %v22_v0 = vld [vmem:[%s504_s0] sm:$0xff]  ;;  %v30_v1 = vld [vmem:[%s506_s2 + $0x10] sm:$0xff]  ;;  %353 = vset.pattern.permute.xlu0 %v406_v3  ;;  %354 = vset.pattern.permute.xlu1 %v406_v3 }
   0x2   :  { %v23_v2 = vpack.c.bf16 %v22_v0, %v22_v0  ;;  %v28_v4 = vld [vmem:[%s506_s2] sm:$0xff]  ;;  %44 = vperm.xlu0 %353, %v30_v1   ;;  %355 = vset.pattern.permute.xlu2 %v406_v3 }
   0x3   :  { %34 = vperm.xlu1 %354, %v28_v4   ;;  %v341_v6 = vld [vmem:[%s505_s1] sm:$0xff] }
   0x4   :  { %v71_v5 = vsel %vm69_vm0, %v23_v2, 0 }
   0x5   :  { %10 = vsyncpa [#allocation3], 0  ;;  %80 = vmatpush.bf16.msra.mxu0 %v71_v5  ;;  %vm62_vm1 = vcmask 64512   ;;  %v31_v7 = vld [vmem:[%s506_s2 + $0x18] sm:$0xff]  ;;  %v29_v8 = vld [vmem:[%s506_s2 + $0x8] sm:$0xff]  ;;  %vm148_vm2 = vcmask 261120  }
   0x6   :  { %v114_v9 = vld [vmem:[%s508_s4] sm:$0xff]  ;;  %v115_v10 = vld [vmem:[%s508_s4 + $0x8] sm:$0xff]  ;;  %v329_v13 = vld [vmem:[%s508_s4 + $0x30] sm:$0xff]  ;;  %s291_s29 = sshll.u32 %s509_s5, 4  ;;  %s408_s30 = smov 128   ;;  %s292_s29 = int_to_ptr.hbm [resolvable:$true] %s291_s29 }
   0x7   :  { %v342_v11 = vld [vmem:[%s505_s1 + $0x8] sm:$0xff]  ;;  %v116_v20 = vld [vmem:[%s508_s4 + $0x10] sm:$0xff]  ;;  %v117_v26 = vld [vmem:[%s508_s4 + $0x18] sm:$0xff]  ;;  %s409_s6 = smov 8  }
   0x8   :  { %311 = vmatmul.msk.bf16.vlgmr.msra.gmra.mxu0 %vm62_vm1, %v341_v6  ;;  %v328_v12 = vld [vmem:[%s508_s4 + $0x28] sm:$0xff]  ;;  %130 = vperm.xlu2 %355, %v116_v20   ;;  %v327_v33 = vld [vmem:[%s508_s4 + $0x20] sm:$0xff]  ;;  %v330_v45 = vld [vmem:[%s508_s4 + $0x38] sm:$0xff] }
   0x9   :  { %v343_v48 = vld [vmem:[%s507_s3] sm:$0xff]  ;;  %v344_v49 = vld [vmem:[%s507_s3 + $0x8] sm:$0xff] }
   0xa   :  { %49 = vperm.xlu0 %353, %v31_v7  }
   0xb   :  { %39 = vperm.xlu1 %354, %v29_v8  }
  0x10   :  { %135 = vperm.xlu2 %355, %v117_v26  }
  0x12   :  { %120 = vperm.xlu0 %353, %v114_v9  }
  0x13   :  { %125 = vperm.xlu1 %354, %v115_v10  }
  0x18   :  { %312 = vmatmul.msk.bf16.gmra.mxu0 %vm62_vm1, %v342_v11  ;;  %204 = vperm.xlu2 %355, %v327_v33  }
  0x1a   :  { %209 = vperm.xlu0 %353, %v328_v12  }
  0x1b   :  { %214 = vperm.xlu1 %354, %v329_v13  }
  0x20   :  { %219 = vperm.xlu2 %355, %v330_v45  }
  0x62   :  { %v131_v51 = vpop.permute.xlu2 %130 }
  0x6a   :  { %v136_v61 = vpop.permute.xlu2 %135 }
  0x74   :  { %v45_v17 = vpop.permute.xlu0 %44 }
  0x75   :  { %v35_v15 = vpop.permute.xlu1 %34 }
  0x7c   :  { %v50_v27 = vpop.permute.xlu0 %49 }
  0x7d   :  { %v40_v21 = vpop.permute.xlu1 %39 }
  0x84   :  { %v121_v56 = vpop.permute.xlu0 %120 }
  0x85   :  { %v82_v14 = vpop.f32.mrf.mxu0  ;;  %v126_v54 = vpop.permute.xlu1 %125 }
  0x86   :  { %v83_v23 = vadd.f32 %v82_v14, %v35_v15 }
  0x88   :  { %v92_v28 = vmul.f32 0.5, %v83_v23 }
  0x8d   :  { %v84_v16 = vpop.f32.mrf.mxu0 }
  0x8e   :  { %v85_v22 = vadd.f32 %v84_v16, %v40_v21  ;;  %v345_v16 = vld [vmem:[%s507_s3 + $0x10] sm:$0xff] }
  0x90   :  { %v93_v25 = vmul.f32 0.5, %v85_v22  ;;  %v210_v22 = vpop.permute.xlu0 %209 }
  0x95   :  { %v87_v18 = vpop.f32.mrf.mxu0 }
  0x96   :  { %v88_v19 = vadd.f32 %v87_v18, %v45_v17  ;;  %v346_v17 = vld [vmem:[%s507_s3 + $0x18] sm:$0xff]  ;;  %v205_v18 = vpop.permute.xlu2 %204  ;;  %s407_s3 = smov [#allocation2]  }
  0x97   :  { %s289_s26 = sshll.u32 %s407_s3, 4  ;;  %s290_s26 = int_to_ptr.vmem [resolvable:$true] %s289_s26 }
  0x98   :  { %v94_v24 = vmul.f32 0.5, %v88_v19 }
  0x9a   :  { %356 = vtanh.f32 %v94_v24 }
  0x9b   :  { %358 = vtanh.f32 %v93_v25 }
  0x9c   :  { %360 = vtanh.f32 %v92_v28 }
  0x9d   :  { %v89_v29 = vpop.f32.mrf.mxu0 }
  0x9e   :  { %v90_v30 = vadd.f32 %v89_v29, %v50_v27  ;;  %v215_v29 = vpop.permute.xlu1 %214 }
  0xa0   :  { %v95_v31 = vmul.f32 0.5, %v90_v30  ;;  %v357_v32 = vpop.eup %356 }
  0xa1   :  { %v359_v34 = vpop.eup %358  ;;  %v102_v36 = vmul.f32 0.5, %v357_v32 }
  0xa2   :  { %362 = vtanh.f32 %v95_v31  ;;  %v361_v35 = vpop.eup %360  ;;  %v101_v38 = vmul.f32 0.5, %v359_v34 }
  0xa3   :  { %v100_v40 = vmul.f32 0.5, %v361_v35  ;;  %v106_v41 = vadd.f32 0.5, %v102_v36 }
  0xa4   :  { %v105_v44 = vadd.f32 0.5, %v101_v38  ;;  %v220_v38 = vpop.permute.xlu2 %219 }
  0xa5   :  { %v104_v46 = vadd.f32 0.5, %v100_v40 }
  0xa7   :  { %v108_v47 = vpack.c.bf16 %v105_v44, %v104_v46 }
  0xa8   :  { %v363_v37 = vpop.eup %362 }
  0xa9   :  { %v103_v39 = vmul.f32 0.5, %v363_v37 }
  0xab   :  { %v107_v42 = vadd.f32 0.5, %v103_v39 }
  0xad   :  { %v109_v43 = vpack.c.bf16 %v107_v42, %v106_v41 }
  0xaf   :  { %161 = vmatpush.bf16.msra.mxu1 %v109_v43  ;;  %347 = vmatpush.bf16.msra.mxu3 %v109_v43 }
  0xb3   :  { %162 = vmatpush.bf16.msra.mxu1 %v108_v47  ;;  %348 = vmatpush.bf16.msra.mxu3 %v108_v47 }
  0xb6   :  { %321 = vmatmul.msk.bf16.vlgmr.msra.gmra.mxu1 %vm148_vm2, %v343_v48  ;;  %322 = vmatmul.msk.bf16.vlgmr.msra.gmra.mxu3 %vm148_vm2, %v344_v49 }
 0x133   :  { %v164_v50 = vpop.f32.mrf.mxu1 }
 0x134   :  { %v165_v58 = vadd.f32 %v164_v50, %v121_v56 }
 0x136   :  { %v174_v62 = vmul.f32 0.5, %v165_v58 }
 0x139   :  { %v169_v52 = vpop.f32.mrf.mxu3 }
 0x13a   :  { %v170_v53 = vadd.f32 %v169_v52, %v131_v51 }
 0x13b   :  { %v166_v55 = vpop.f32.mrf.mxu1 }
 0x13c   :  { %v167_v57 = vadd.f32 %v166_v55, %v126_v54  ;;  %v176_v59 = vmul.f32 0.5, %v170_v53 }
 0x13e   :  { %v175_v60 = vmul.f32 0.5, %v167_v57  ;;  %364 = vtanh.f32 %v176_v59 }
 0x140   :  { %366 = vtanh.f32 %v175_v60 }
 0x141   :  { %v171_v63 = vpop.f32.mrf.mxu3  ;;  %368 = vtanh.f32 %v174_v62 }
 0x142   :  { %v172_v0 = vadd.f32 %v171_v63, %v136_v61 }
 0x144   :  { %v177_v1 = vmul.f32 0.5, %v172_v0  ;;  %v365_v2 = vpop.eup %364 }
 0x145   :  { %v184_v5 = vmul.f32 0.5, %v365_v2 }
 0x146   :  { %370 = vtanh.f32 %v177_v1  ;;  %v367_v3 = vpop.eup %366 }
 0x147   :  { %v369_v4 = vpop.eup %368  ;;  %v183_v7 = vmul.f32 0.5, %v367_v3  ;;  %v188_v10 = vadd.f32 0.5, %v184_v5 }
 0x148   :  { %v182_v9 = vmul.f32 0.5, %v369_v4 }
 0x149   :  { %v187_v13 = vadd.f32 0.5, %v183_v7 }
 0x14a   :  { %v186_v14 = vadd.f32 0.5, %v182_v9 }
 0x14c   :  { %v371_v6 = vpop.eup %370  ;;  %v190_v15 = vpack.c.bf16 %v187_v13, %v186_v14 }
 0x14d   :  { %v185_v8 = vmul.f32 0.5, %v371_v6 }
 0x14f   :  { %v189_v11 = vadd.f32 0.5, %v185_v8 }
 0x151   :  { %v191_v12 = vpack.c.bf16 %v189_v11, %v188_v10 }
 0x153   :  { %244 = vmatpush.bf16.msra.mxu2 %v191_v12 }
 0x157   :  { %245 = vmatpush.bf16.msra.mxu2 %v190_v15 }
 0x15a   :  { %339 = vmatmul.msk.bf16.vlgmr.msra.gmra.mxu2 %vm148_vm2, %v345_v16 }
 0x16a   :  { %340 = vmatmul.msk.bf16.gmra.mxu2 %vm148_vm2, %v346_v17 }
 0x1dd   :  { %v247_v19 = vpop.f32.mrf.mxu2 }
 0x1de   :  { %v248_v20 = vadd.f32 %v247_v19, %v205_v18 }
 0x1e0   :  { %v257_v21 = vmul.f32 0.5, %v248_v20 }
 0x1e2   :  { %372 = vtanh.f32 %v257_v21 }
 0x1e5   :  { %v249_v23 = vpop.f32.mrf.mxu2 }
 0x1e6   :  { %v250_v24 = vadd.f32 %v249_v23, %v210_v22 }
 0x1e8   :  { %v373_v25 = vpop.eup %372  ;;  %v258_v26 = vmul.f32 0.5, %v250_v24 }
 0x1e9   :  { %v265_v27 = vmul.f32 0.5, %v373_v25 }
 0x1ea   :  { %374 = vtanh.f32 %v258_v26 }
 0x1eb   :  { %v269_v28 = vadd.f32 0.5, %v265_v27 }
 0x1ed   :  { %v273_v30 = vpack.c.bf16 %v269_v28, %v269_v28  ;;  %v252_v31 = vpop.f32.mrf.mxu2 }
 0x1ee   :  { %v253_v32 = vadd.f32 %v252_v31, %v215_v29 }
 0x1ef   :  { %v277_v33 = vunpack.c.l.bf16 %v273_v30 }
 0x1f0   :  { %v375_v34 = vpop.eup %374  ;;  %v259_v35 = vmul.f32 0.5, %v253_v32 }
 0x1f1   :  { %281 = vst [vmem:[#allocation2] sm:$0xff] %v277_v33  ;;  %v266_v36 = vmul.f32 0.5, %v375_v34 }
 0x1f2   :  { %376 = vtanh.f32 %v259_v35 }
 0x1f3   :  { %v270_v37 = vadd.f32 0.5, %v266_v36 }
 0x1f5   :  { %v274_v39 = vpack.c.bf16 %v270_v37, %v270_v37  ;;  %v254_v40 = vpop.f32.mrf.mxu2 }
 0x1f6   :  { %v255_v41 = vadd.f32 %v254_v40, %v220_v38 }
 0x1f7   :  { %v278_v42 = vunpack.c.l.bf16 %v274_v39 }
 0x1f8   :  { %v377_v43 = vpop.eup %376  ;;  %v260_v44 = vmul.f32 0.5, %v255_v41 }
 0x1f9   :  { %282 = vst [vmem:[#allocation2 + $0x8] sm:$0xff] %v278_v42  ;;  %v267_v45 = vmul.f32 0.5, %v377_v43 }
 0x1fa   :  { %378 = vtanh.f32 %v260_v44 }
 0x1fb   :  { %v271_v46 = vadd.f32 0.5, %v267_v45 }
 0x1fd   :  { %v275_v47 = vpack.c.bf16 %v271_v46, %v271_v46 }
 0x1ff   :  { %v279_v48 = vunpack.c.l.bf16 %v275_v47 }
 0x200   :  { %v379_v49 = vpop.eup %378 }
 0x201   :  { %283 = vst [vmem:[#allocation2 + $0x10] sm:$0xff] %v279_v48  ;;  %v268_v50 = vmul.f32 0.5, %v379_v49 }
 0x203   :  { %v272_v51 = vadd.f32 0.5, %v268_v50 }
 0x205   :  { %v276_v52 = vpack.c.bf16 %v272_v51, %v272_v51 }
 0x207   :  { %v280_v53 = vunpack.c.l.bf16 %v276_v52 }
 0x209   :  { %284 = vst [vmem:[#allocation2 + $0x18] sm:$0xff] %v280_v53 }
 0x20a   :  { %297 = dma.vmem_to_hbm [thread:$0]  %s290_s26, 512, %s292_s29, [#allocation3], %s408_s30, %s408_s30, %s409_s6  }
 0x20b   :  { %404 = dma.done.wait [#allocation3], 512  }
 0x20c   :  { %405 = vsyncadd [#allocation3], 4294966784 }
 0x20d   :  { %302 = vsyncpa [#allocation3], 1 }

</bundles_post_ra>
